<compile_context>
chip_gen: v5e
topology: v5e:2x2
jax: 0.10.0
libtpu: 0.0.40
codegen_flags: <defaults>
</compile_context>

<pallas_src>
import jax
import jax.numpy as jnp
from jax.experimental import pallas as pl
from jax.experimental.pallas import tpu as pltpu


_VMEM_LIMIT = 32 * 1024 * 1024   # explicit scoped-VMEM budget, safe on v5e/v6e/v7x


def _round_up(x, m):
    return (x + m - 1) // m * m


def _choose_tiling(mp, tile_m, *, sub=16, min_steps=2):
    """Pick an M tile (multiple of `sub`, for bf16 sublane packing) and a padded M.

    Ensures at least `min_steps` grid steps when the problem allows it, so
    dimension_semantics=("parallel",) can shard the M axis across v7x's two
    TensorCores; caps the tile at tile_m."""
    tm = min(tile_m, _round_up(mp, sub))
    if pl.cdiv(mp, tm) < min_steps:
        tm = max(sub, _round_up(pl.cdiv(mp, min_steps), sub))
    mpad = _round_up(mp, tm)
    return tm, mpad


# ----------------------------- Pallas kernels ------------------------------

def _conv_relu_pool_kernel(x_ref, w_ref, b_ref, o_ref):
    """Fused conv(3x3) + bias + ReLU + 2x2 maxpool with a single MXU matmul.

    x_ref: (TM, K)     bf16 stride-2 4x4-window patches, one row per pooled position
    w_ref: (K, 4*C)    bf16 merged weight: 3x3 kernel at the 4 pool positions,
                       columns ordered [pos0 | pos1 | pos2 | pos3], each C wide
    b_ref: (1, C)      f32
    o_ref: (TM, C)     bf16 pooled activation
    """
    c = o_ref.shape[-1]
    y = jnp.dot(x_ref[...], w_ref[...], preferred_element_type=jnp.float32)  # (TM, 4C)
    m = jnp.maximum(jnp.maximum(y[:, 0:c], y[:, c:2 * c]),
                    jnp.maximum(y[:, 2 * c:3 * c], y[:, 3 * c:4 * c]))
    # max_ab relu(y_ab + b) == relu(max_ab(y_ab) + b): bias shared over the pool
    # window and ReLU is monotone.
    o_ref[...] = jnp.maximum(m + b_ref[...], 0.0).astype(o_ref.dtype)


def _matmul_bias_kernel(x_ref, w_ref, b_ref, o_ref):
    """o = x @ w + b (final FC; output column dim already padded to 128 lanes)."""
    y = jnp.dot(x_ref[...], w_ref[...], preferred_element_type=jnp.float32)
    o_ref[...] = (y + b_ref[...]).astype(o_ref.dtype)


# ----------------------------- Pallas wrappers ------------------------------

def conv_relu_pool(x_nhwc, w_merged, bias, *, tile_m=1024):
    """3x3 valid conv + bias + ReLU + 2x2 maxpool (floor), fused in one Pallas kernel."""
    n, h, w, cin = x_nhwc.shape
    hp, wp = (h - 2) // 2, (w - 2) // 2
    k = 16 * cin
    cout4 = w_merged.shape[-1]
    cout = cout4 // 4

    x_nhwc = x_nhwc.astype(jnp.bfloat16)

    # Stride-2 4x4-window patches: one row per *pooled* output position.
    # TODO(synk): the stride-2 window gather + concat stays XLA glue (bf16 halves its
    # HBM footprint vs the previous f32 version); folding it into the kernel via
    # memory_space=pl.ANY + manual DMA would remove this HBM round trip entirely.
    cols = []
    for u in range(4):
        for v in range(4):
            cols.append(x_nhwc[:, u:u + 2 * hp:2, v:v + 2 * wp:2, :])
    x4 = jnp.concatenate(cols, axis=-1).reshape(n * hp * wp, k)

    mp = n * hp * wp
    tm, mpad = _choose_tiling(mp, tile_m)
    if mpad != mp:
        # Padded rows produce relu(bias) garbage; they are sliced off below ([:mp]).
        x4 = jnp.pad(x4, ((0, mpad - mp), (0, 0)))

    cost = pl.CostEstimate(
        flops=2 * mpad * k * cout4,
        transcendentals=0,
        bytes_accessed=2 * mpad * k + 2 * k * cout4 + 4 * cout + 2 * mpad * cout,
    )
    pooled = pl.pallas_call(
        _conv_relu_pool_kernel,
        out_shape=jax.ShapeDtypeStruct((mpad, cout), jnp.bfloat16),
        grid=(mpad // tm,),
        in_specs=[
            pl.BlockSpec((tm, k), lambda i: (i, 0)),
            pl.BlockSpec((k, cout4), lambda i: (0, 0)),
            pl.BlockSpec((1, cout), lambda i: (0, 0)),
        ],
        # TODO(synk): the pooled store is 16/32 lanes wide (masked vst); packing 8/4
        # pooled rows into one 128-lane output row needs an in-kernel sublane->lane
        # reshape that we avoid here for lowering robustness.
        out_specs=pl.BlockSpec((tm, cout), lambda i: (i, 0)),
        compiler_params=pltpu.CompilerParams(
            dimension_semantics=("parallel",),
            vmem_limit_bytes=_VMEM_LIMIT,
        ),
        cost_estimate=cost,
    )(x4, w_merged, bias.reshape(1, cout))

    return pooled[:mp].reshape(n, hp, wp, cout)


def linear(x, w, b, *, tile_m=512):
    """x:(M,K) @ w:(K,N) + b:(N,), M-tiled with a parallel grid, bf16 in / f32 out."""
    m, k = x.shape
    kw_, nn = w.shape
    assert k == kw_
    x = x.astype(jnp.bfloat16)
    tm, mpad = _choose_tiling(m, tile_m)
    if mpad != m:
        x = jnp.pad(x, ((0, mpad - m), (0, 0)))

    cost = pl.CostEstimate(
        flops=2 * mpad * k * nn,
        transcendentals=0,
        bytes_accessed=2 * mpad * k + 2 * k * nn + 4 * nn + 4 * mpad * nn,
    )
    out = pl.pallas_call(
        _matmul_bias_kernel,
        out_shape=jax.ShapeDtypeStruct((mpad, nn), jnp.float32),
        grid=(mpad // tm,),
        in_specs=[
            pl.BlockSpec((tm, k), lambda i: (i, 0)),
            pl.BlockSpec((k, nn), lambda i: (0, 0)),
            pl.BlockSpec((1, nn), lambda i: (0, 0)),
        ],
        out_specs=pl.BlockSpec((tm, nn), lambda i: (i, 0)),
        compiler_params=pltpu.CompilerParams(
            dimension_semantics=("parallel",),
            vmem_limit_bytes=_VMEM_LIMIT,
        ),
        cost_estimate=cost,
    )(x, w, b.reshape(1, nn))
    return out[:m]


# ------------------------------- Model glue ----------------------------------

def cnn_forward(x_nchw, params):
    n = x_nchw.shape[0]
    x = jnp.transpose(x_nchw, (0, 2, 3, 1))                      # NHWC (N,28,28,1)
    h1 = conv_relu_pool(x, params["w1"], params["b1"])           # (N,13,13,16) bf16
    h2 = conv_relu_pool(h1, params["w2"], params["b2"])          # (N,5,5,32)  bf16
    feat = h2.reshape(n, 5 * 5 * 32)                             # NHWC-flat order
    logits = linear(feat, params["wfc"], params["bfc"])          # (N,128) lane-padded
    return logits[:, :10]


def _make_pool_conv_weight(wt_oihw):
    """PyTorch (Cout,Cin,3,3) -> bf16 (16*Cin, 4*Cout): 3x3 kernel placed at each of
    the 4 positions of a stride-2 4x4 window (one Cout-wide column slab per 2x2-maxpool
    candidate), merged along the output axis so the kernel runs ONE MXU matmul."""
    cout, cin, _, _ = wt_oihw.shape
    w_hwio = jnp.transpose(wt_oihw, (2, 3, 1, 0)).astype(jnp.float32)   # (kh, kw, ci, co)
    w4 = jnp.zeros((2, 2, 4, 4, cin, cout), jnp.float32)
    for a in range(2):
        for b in range(2):
            w4 = w4.at[a, b, a:a + 3, b:b + 3, :, :].set(w_hwio)
    # Row index = (u*4 + v)*cin + c  (matches x4 construction);
    # column index = (a*2 + b)*cout + co  (matches the kernel's 4 lane-group slices).
    w_merged = jnp.transpose(w4, (2, 3, 4, 0, 1, 5)).reshape(16 * cin, 4 * cout)
    return w_merged.astype(jnp.bfloat16)


def init_params(key):
    k1, k2, k3, k4, k5, k6 = jax.random.split(key, 6)
    # PyTorch layouts: conv weight (Cout,Cin,KH,KW), linear weight (out,in).
    w1_oihw = jax.random.normal(k1, (16, 1, 3, 3), jnp.float32) * 0.1
    b1 = jax.random.normal(k2, (16,), jnp.float32) * 0.1
    w2_oihw = jax.random.normal(k3, (32, 16, 3, 3), jnp.float32) * 0.05
    b2 = jax.random.normal(k4, (32,), jnp.float32) * 0.1
    wfc_pt = jax.random.normal(k5, (10, 32 * 5 * 5), jnp.float32) * 0.05
    bfc = jax.random.normal(k6, (10,), jnp.float32) * 0.1

    # Fold the NCHW flatten into the FC weight (rows reordered to NHWC-flat order),
    # and pad the FC output 10 -> 128 so the kernel's store is lane-dense.
    wfc = jnp.transpose(wfc_pt.reshape(10, 32, 5, 5), (2, 3, 1, 0)).reshape(800, 10)
    wfc = jnp.pad(wfc, ((0, 0), (0, 118))).astype(jnp.bfloat16)
    bfc_pad = jnp.pad(bfc, (0, 118))

    return {
        "w1": _make_pool_conv_weight(w1_oihw), "b1": b1,
        "w2": _make_pool_conv_weight(w2_oihw), "b2": b2,
        "wfc": wfc, "bfc": bfc_pad,
    }


if __name__ == "__main__":
    key = jax.random.PRNGKey(0)
    kp, kx = jax.random.split(key)
    params = init_params(kp)

    # MNIST-like input implied by the fc layer (32*5*5): batch=2, 1x28x28, NCHW.
    x = jax.random.normal(kx, (2, 1, 28, 28), jnp.float32)

    logits = jax.jit(cnn_forward)(x, params)
    jax.block_until_ready(logits)
    assert logits.shape == (2, 10) and logits.dtype == jnp.float32
    print("KERNEL_OK")
</pallas_src>

<mosaic_0001>
module attributes {stable_mosaic.version = 11 : i64} {
  func.func @_conv_relu_pool_kernel(%arg0: i32, %arg1: memref<176x16xbf16, #tpu.memory_space<vmem>>, %arg2: memref<16x64xbf16, #tpu.memory_space<vmem>>, %arg3: memref<1x16xf32, #tpu.memory_space<vmem>>, %arg4: memref<176x16xbf16, #tpu.memory_space<vmem>>) attributes {dimension_semantics = [#tpu.dimension_semantics<parallel>], iteration_bounds = array<i64: 2>, scalar_prefetch = 0 : i64, scratch_operands = 0 : i64, tpu.core_type = #tpu.core_type<tc>, window_params = [{transform_indices = @transform_0, window_bounds = array<i64: 176, 16>}, {pipeline_mode = #tpu.pipeline_mode<synchronous>, transform_indices = @transform_1, window_bounds = array<i64: 16, 64>}, {pipeline_mode = #tpu.pipeline_mode<synchronous>, transform_indices = @transform_2, window_bounds = array<i64: 1, 16>}, {transform_indices = @transform_3, window_bounds = array<i64: 176, 16>}]} {
    %c0 = arith.constant 0 : index
    %c0_0 = arith.constant 0 : index
    %0 = vector.load %arg1[%c0, %c0_0] : memref<176x16xbf16, #tpu.memory_space<vmem>>, vector<176x16xbf16>
    %c0_1 = arith.constant 0 : index
    %c0_2 = arith.constant 0 : index
    %1 = vector.load %arg2[%c0_1, %c0_2] : memref<16x64xbf16, #tpu.memory_space<vmem>>, vector<16x64xbf16>
    %cst = arith.constant dense<0.000000e+00> : vector<176x64xf32>
    %2 = tpu.matmul %0, %1, %cst {dimension_numbers = #tpu.dot_dimension_numbers<[1], [0], [0], [1], [0, 0, 1, 1], [], []>} : vector<176x16xbf16>, vector<16x64xbf16>, vector<176x64xf32> -> vector<176x64xf32>
    %3 = vector.extract_strided_slice %2 {offsets = [0, 0], sizes = [176, 16], strides = [1, 1]} : vector<176x64xf32> to vector<176x16xf32>
    %4 = vector.extract_strided_slice %2 {offsets = [0, 16], sizes = [176, 16], strides = [1, 1]} : vector<176x64xf32> to vector<176x16xf32>
    %5 = arith.maximumf %3, %4 : vector<176x16xf32>
    %6 = vector.extract_strided_slice %2 {offsets = [0, 32], sizes = [176, 16], strides = [1, 1]} : vector<176x64xf32> to vector<176x16xf32>
    %7 = vector.extract_strided_slice %2 {offsets = [0, 48], sizes = [176, 16], strides = [1, 1]} : vector<176x64xf32> to vector<176x16xf32>
    %8 = arith.maximumf %6, %7 : vector<176x16xf32>
    %9 = arith.maximumf %5, %8 : vector<176x16xf32>
    %c0_3 = arith.constant 0 : index
    %c0_4 = arith.constant 0 : index
    %10 = vector.load %arg3[%c0_3, %c0_4] : memref<1x16xf32, #tpu.memory_space<vmem>>, vector<1x16xf32>
    %11 = vector.broadcast %10 : vector<1x16xf32> to vector<176x16xf32>
    %12 = arith.addf %9, %11 : vector<176x16xf32>
    %cst_5 = arith.constant 0.000000e+00 : f32
    %13 = vector.broadcast %cst_5 : f32 to vector<176x16xf32>
    %14 = arith.maximumf %12, %13 : vector<176x16xf32>
    %15 = arith.truncf %14 : vector<176x16xf32> to vector<176x16xbf16>
    %c0_6 = arith.constant 0 : index
    %c0_7 = arith.constant 0 : index
    %16 = vector.load %arg4[%c0_6, %c0_7] : memref<176x16xbf16, #tpu.memory_space<vmem>>, vector<176x16xbf16>
    tpu.vector_store %arg4[%c0_6, %c0_7], %15 {strides = array<i32>} : memref<176x16xbf16, #tpu.memory_space<vmem>>, vector<176x16xbf16>,
    return
  }
  func.func @transform_0(%arg0: i32) -> (i32, i32) {
    %c0_i32 = arith.constant 0 : i32
    %c0_i32_0 = arith.constant 0 : i32
    return %arg0, %c0_i32 : i32, i32
  }
  func.func @transform_1(%arg0: i32) -> (i32, i32) {
    %c0_i32 = arith.constant 0 : i32
    %c0_i32_0 = arith.constant 0 : i32
    %c0_i32_1 = arith.constant 0 : i32
    return %c0_i32, %c0_i32_0 : i32, i32
  }
  func.func @transform_2(%arg0: i32) -> (i32, i32) {
    %c0_i32 = arith.constant 0 : i32
    %c0_i32_0 = arith.constant 0 : i32
    %c0_i32_1 = arith.constant 0 : i32
    return %c0_i32, %c0_i32_0 : i32, i32
  }
  func.func @transform_3(%arg0: i32) -> (i32, i32) {
    %c0_i32 = arith.constant 0 : i32
    %c0_i32_0 = arith.constant 0 : i32
    return %arg0, %c0_i32 : i32, i32
  }
}

module attributes {stable_mosaic.version = 11 : i64} {
  func.func @_conv_relu_pool_kernel(%arg0: i32, %arg1: memref<32x256xbf16, #tpu.memory_space<vmem>>, %arg2: memref<256x128xbf16, #tpu.memory_space<vmem>>, %arg3: memref<1x32xf32, #tpu.memory_space<vmem>>, %arg4: memref<32x32xbf16, #tpu.memory_space<vmem>>) attributes {dimension_semantics = [#tpu.dimension_semantics<parallel>], iteration_bounds = array<i64: 2>, scalar_prefetch = 0 : i64, scratch_operands = 0 : i64, tpu.core_type = #tpu.core_type<tc>, window_params = [{transform_indices = @transform_0, window_bounds = array<i64: 32, 256>}, {pipeline_mode = #tpu.pipeline_mode<synchronous>, transform_indices = @transform_1, window_bounds = array<i64: 256, 128>}, {pipeline_mode = #tpu.pipeline_mode<synchronous>, transform_indices = @transform_2, window_bounds = array<i64: 1, 32>}, {transform_indices = @transform_3, window_bounds = array<i64: 32, 32>}]} {
    %c0 = arith.constant 0 : index
    %c0_0 = arith.constant 0 : index
    %0 = vector.load %arg1[%c0, %c0_0] : memref<32x256xbf16, #tpu.memory_space<vmem>>, vector<32x256xbf16>
    %c0_1 = arith.constant 0 : index
    %c0_2 = arith.constant 0 : index
    %1 = vector.load %arg2[%c0_1, %c0_2] : memref<256x128xbf16, #tpu.memory_space<vmem>>, vector<256x128xbf16>
    %cst = arith.constant dense<0.000000e+00> : vector<32x128xf32>
    %2 = tpu.matmul %0, %1, %cst {dimension_numbers = #tpu.dot_dimension_numbers<[1], [0], [0], [1], [0, 0, 1, 1], [], []>} : vector<32x256xbf16>, vector<256x128xbf16>, vector<32x128xf32> -> vector<32x128xf32>
    %3 = vector.extract_strided_slice %2 {offsets = [0, 0], sizes = [32, 32], strides = [1, 1]} : vector<32x128xf32> to vector<32x32xf32>
    %4 = vector.extract_strided_slice %2 {offsets = [0, 32], sizes = [32, 32], strides = [1, 1]} : vector<32x128xf32> to vector<32x32xf32>
    %5 = arith.maximumf %3, %4 : vector<32x32xf32>
    %6 = vector.extract_strided_slice %2 {offsets = [0, 64], sizes = [32, 32], strides = [1, 1]} : vector<32x128xf32> to vector<32x32xf32>
    %7 = vector.extract_strided_slice %2 {offsets = [0, 96], sizes = [32, 32], strides = [1, 1]} : vector<32x128xf32> to vector<32x32xf32>
    %8 = arith.maximumf %6, %7 : vector<32x32xf32>
    %9 = arith.maximumf %5, %8 : vector<32x32xf32>
    %c0_3 = arith.constant 0 : index
    %c0_4 = arith.constant 0 : index
    %10 = vector.load %arg3[%c0_3, %c0_4] : memref<1x32xf32, #tpu.memory_space<vmem>>, vector<1x32xf32>
    %11 = vector.broadcast %10 : vector<1x32xf32> to vector<32x32xf32>
    %12 = arith.addf %9, %11 : vector<32x32xf32>
    %cst_5 = arith.constant 0.000000e+00 : f32
    %13 = vector.broadcast %cst_5 : f32 to vector<32x32xf32>
    %14 = arith.maximumf %12, %13 : vector<32x32xf32>
    %15 = arith.truncf %14 : vector<32x32xf32> to vector<32x32xbf16>
    %c0_6 = arith.constant 0 : index
    %c0_7 = arith.constant 0 : index
    %16 = vector.load %arg4[%c0_6, %c0_7] : memref<32x32xbf16, #tpu.memory_space<vmem>>, vector<32x32xbf16>
    tpu.vector_store %arg4[%c0_6, %c0_7], %15 {strides = array<i32>} : memref<32x32xbf16, #tpu.memory_space<vmem>>, vector<32x32xbf16>,
    return
  }
  func.func @transform_0(%arg0: i32) -> (i32, i32) {
    %c0_i32 = arith.constant 0 : i32
    %c0_i32_0 = arith.constant 0 : i32
    return %arg0, %c0_i32 : i32, i32
  }
  func.func @transform_1(%arg0: i32) -> (i32, i32) {
    %c0_i32 = arith.constant 0 : i32
    %c0_i32_0 = arith.constant 0 : i32
    %c0_i32_1 = arith.constant 0 : i32
    return %c0_i32, %c0_i32_0 : i32, i32
  }
  func.func @transform_2(%arg0: i32) -> (i32, i32) {
    %c0_i32 = arith.constant 0 : i32
    %c0_i32_0 = arith.constant 0 : i32
    %c0_i32_1 = arith.constant 0 : i32
    return %c0_i32, %c0_i32_0 : i32, i32
  }
  func.func @transform_3(%arg0: i32) -> (i32, i32) {
    %c0_i32 = arith.constant 0 : i32
    %c0_i32_0 = arith.constant 0 : i32
    return %arg0, %c0_i32 : i32, i32
  }
}

module attributes {stable_mosaic.version = 11 : i64} {
  func.func @_matmul_bias_kernel(%arg0: i32, %arg1: memref<16x800xbf16, #tpu.memory_space<vmem>>, %arg2: memref<800x128xbf16, #tpu.memory_space<vmem>>, %arg3: memref<1x128xf32, #tpu.memory_space<vmem>>, %arg4: memref<16x128xf32, #tpu.memory_space<vmem>>) attributes {dimension_semantics = [#tpu.dimension_semantics<parallel>], iteration_bounds = array<i64: 1>, scalar_prefetch = 0 : i64, scratch_operands = 0 : i64, tpu.core_type = #tpu.core_type<tc>, window_params = [{transform_indices = @transform_0, window_bounds = array<i64: 16, 800>}, {pipeline_mode = #tpu.pipeline_mode<synchronous>, transform_indices = @transform_1, window_bounds = array<i64: 800, 128>}, {pipeline_mode = #tpu.pipeline_mode<synchronous>, transform_indices = @transform_2, window_bounds = array<i64: 1, 128>}, {transform_indices = @transform_3, window_bounds = array<i64: 16, 128>}]} {
    %c0 = arith.constant 0 : index
    %c0_0 = arith.constant 0 : index
    %0 = vector.load %arg1[%c0, %c0_0] : memref<16x800xbf16, #tpu.memory_space<vmem>>, vector<16x800xbf16>
    %c0_1 = arith.constant 0 : index
    %c0_2 = arith.constant 0 : index
    %1 = vector.load %arg2[%c0_1, %c0_2] : memref<800x128xbf16, #tpu.memory_space<vmem>>, vector<800x128xbf16>
    %cst = arith.constant dense<0.000000e+00> : vector<16x128xf32>
    %2 = tpu.matmul %0, %1, %cst {dimension_numbers = #tpu.dot_dimension_numbers<[1], [0], [0], [1], [0, 0, 1, 1], [], []>} : vector<16x800xbf16>, vector<800x128xbf16>, vector<16x128xf32> -> vector<16x128xf32>
    %c0_3 = arith.constant 0 : index
    %c0_4 = arith.constant 0 : index
    %3 = vector.load %arg3[%c0_3, %c0_4] : memref<1x128xf32, #tpu.memory_space<vmem>>, vector<1x128xf32>
    %4 = vector.broadcast %3 : vector<1x128xf32> to vector<16x128xf32>
    %5 = arith.addf %2, %4 : vector<16x128xf32>
    %c0_5 = arith.constant 0 : index
    %c0_6 = arith.constant 0 : index
    %6 = vector.load %arg4[%c0_5, %c0_6] : memref<16x128xf32, #tpu.memory_space<vmem>>, vector<16x128xf32>
    tpu.vector_store %arg4[%c0_5, %c0_6], %5 {strides = array<i32>} : memref<16x128xf32, #tpu.memory_space<vmem>>, vector<16x128xf32>,
    return
  }
  func.func @transform_0(%arg0: i32) -> (i32, i32) {
    %c0_i32 = arith.constant 0 : i32
    %c0_i32_0 = arith.constant 0 : i32
    return %arg0, %c0_i32 : i32, i32
  }
  func.func @transform_1(%arg0: i32) -> (i32, i32) {
    %c0_i32 = arith.constant 0 : i32
    %c0_i32_0 = arith.constant 0 : i32
    %c0_i32_1 = arith.constant 0 : i32
    return %c0_i32, %c0_i32_0 : i32, i32
  }
  func.func @transform_2(%arg0: i32) -> (i32, i32) {
    %c0_i32 = arith.constant 0 : i32
    %c0_i32_0 = arith.constant 0 : i32
    %c0_i32_1 = arith.constant 0 : i32
    return %c0_i32, %c0_i32_0 : i32, i32
  }
  func.func @transform_3(%arg0: i32) -> (i32, i32) {
    %c0_i32 = arith.constant 0 : i32
    %c0_i32_0 = arith.constant 0 : i32
    return %arg0, %c0_i32 : i32, i32
  }
}

</mosaic_0001>

<bundles_post_ra>
// kernel: cnn_forward.3
= control target key start
LH: loop header
LB: loop body
LE: loop exit
PB: predicated region body
PF: predicated region fallthrough
CT: control target
= control target key end

     0   :  { %s851_s12 = smov 0   ;;  %s1114_s0 = inlined_call_operand.vmem [shape: bf16[352,16], index: 0, kind: input, shape index: {}]   ;;  %s1115_s1 = inlined_call_operand.vmem [shape: bf16[16,64], index: 1, kind: input, shape index: {}]   ;;  %s1116_s2 = inlined_call_operand.vmem [shape: f32[1,16], index: 2, kind: input, shape index: {}]   ;;  %s1117_s3 = inlined_call_operand.vmem [shape: bf16[352,16], index: 3, kind: output, shape index: {}]  }
   0x1 LB: > { %s727_s13 = sadd.s32 4294967295, %s827_s12   ;;  %p731_p0 = scmp.ge.s32.totalorder %s827_s12, 1  ;;  %s827_s12 = sphi %s851_s12, %s13_s12  }
   0x2   : > { %p138_p1 = scmp.lt.s32.totalorder %s827_s12, 3 }
   0x4   : > { %p139_p2 = pnand %p731_p0, %p138_p1 }
   0x5   : > { %s162_s16 = smul.u32 (!%p139_p2), 22, %s727_s13  ;;  %s829_s21 = smov (!%p139_p2), 112  }
   0x6   : > { %142 = sbr.rel (%p139_p2) target bundleno = 462 (0x1ce), region = 32  ;;  %s830_s22 = smov (!%p139_p2), 96  }
   0x7   : > { %p163_p3 = scmp.lt.s32.totalorder (!%p139_p2), %s162_s16, 43 }
   0xb   : > { %v806_v0 = vld [vmem:[%s1115_s1] sm:$0xff]  ;;  %s1119_s16 = smov (!%p163_p3, %s162_s16), 43  ;;  %vm260_vm0 = vcmask 130048   ;;  %vm648_vm1 = vcmask 125952  }
   0xc   : > { %301 = vmatpush.bf16.msra.mxu0 %v806_v0  ;;  %807 = vmatpush.bf16.msra.mxu1 %v806_v0  ;;  %s732_s17 = sshll.u32 %s1119_s16, 2 }
   0xd   : > { %808 = vmatpush.bf16.msra.mxu2 %v806_v0  ;;  %809 = vmatpush.bf16.msra.mxu3 %v806_v0  ;;  %s166_s20 = scalar_lea.vmem %s1114_s0, %s732_s17  ;;  %s1024_s27 = scalar_lea.vmem %s1117_s3, %s732_s17 }
   0xe   : > { %v795_v1 = vld [vmem:[%s166_s20] sm:$0xff]  ;;  %v798_v2 = vld [vmem:[%s166_s20 + $0x18] sm:$0xff]  ;;  %v801_v3 = vld [vmem:[%s166_s20 + $0x30] sm:$0xff] }
   0xf   : > { %v804_v4 = vld [vmem:[%s166_s20 + $0x48] sm:$0xff]  ;;  %782 = vmatmul.msk.bf16.vlgmr.msra.gmra.mxu0 %vm260_vm0, %v795_v1  ;;  %785 = vmatmul.msk.bf16.vlgmr.msra.gmra.mxu1 %vm260_vm0, %v798_v2  ;;  %v799_v5 = vld [vmem:[%s166_s20 + $0x20] sm:$0xff]  ;;  %v802_v7 = vld [vmem:[%s166_s20 + $0x38] sm:$0xff] }
  0x10   : > { %788 = vmatmul.msk.bf16.vlgmr.msra.gmra.mxu2 %vm260_vm0, %v801_v3  ;;  %791 = vmatmul.msk.bf16.vlgmr.msra.gmra.mxu3 %vm260_vm0, %v804_v4  ;;  %v796_v6 = vld [vmem:[%s166_s20 + $0x8] sm:$0xff]  ;;  %v805_v8 = vld [vmem:[%s166_s20 + $0x50] sm:$0xff]  ;;  %v803_v11 = vld [vmem:[%s166_s20 + $0x40] sm:$0xff] }
  0x11   : > { %v797_v9 = vld [vmem:[%s166_s20 + $0x10] sm:$0xff]  ;;  %v800_v10 = vld [vmem:[%s166_s20 + $0x28] sm:$0xff] }
  0x1f   : > { %786 = vmatmul.msk.bf16.gmra.mxu1 %vm260_vm0, %v799_v5  ;;  %783 = vmatmul.msk.bf16.gmra.mxu0 %vm260_vm0, %v796_v6 }
  0x20   : > { %789 = vmatmul.msk.bf16.gmra.mxu2 %vm260_vm0, %v802_v7  ;;  %792 = vmatmul.msk.bf16.gmra.mxu3 %vm260_vm0, %v805_v8 }
  0x2f   : > { %784 = vmatmul.msk.bf16.gmra.mxu0 %vm260_vm0, %v797_v9  ;;  %787 = vmatmul.msk.bf16.gmra.mxu1 %vm260_vm0, %v800_v10 }
  0x30   : > { %790 = vmatmul.msk.bf16.gmra.mxu2 %vm260_vm0, %v803_v11 }
  0x8c   : > { %v303_v12 = vpop.f32.mrf.mxu0  ;;  %v318_v13 = vpop.f32.mrf.mxu1 }
  0x8d   : > { %380 = vrot.lane.b32.xlu0 %v303_v12, %s829_s21 }
  0x93   : > { %v333_v14 = vpop.f32.mrf.mxu2  ;;  %v348_v17 = vpop.f32.mrf.mxu3 }
  0x94   : > { %v882_v15 = vpop.f32.mrf.mxu1  ;;  %v305_v16 = vpop.f32.mrf.mxu0 }
  0x95   : > { %394 = vrot.lane.b32.xlu1 %v882_v15, %s829_s21  ;;  %392 = vrot.lane.b32.xlu0 %v318_v13, %s829_s21 }
  0x9b   : > { %v887_v18 = vpop.f32.mrf.mxu2  ;;  %v893_v21 = vpop.f32.mrf.mxu3 }
  0x9c   : > { %v323_v19 = vpop.f32.mrf.mxu1  ;;  %v308_v20 = vpop.f32.mrf.mxu0 }
  0x9d   : > { %406 = vrot.lane.b32.xlu1 %v887_v18, %s829_s21  ;;  %396 = vrot.lane.b32.xlu2 %v323_v19, %s829_s21 }
  0x9e   : > { %404 = vrot.lane.b32.xlu0 %v333_v14, %s829_s21 }
  0xa3   : > { %v338_v22 = vpop.f32.mrf.mxu2  ;;  %v899_v24 = vpop.f32.mrf.mxu3 }
  0xa4   : > { %v310_v23 = vpop.f32.mrf.mxu0  ;;  %v325_v25 = vpop.f32.mrf.mxu1 }
  0xa5   : > { %418 = vrot.lane.b32.xlu1 %v893_v21, %s829_s21  ;;  %408 = vrot.lane.b32.xlu2 %v338_v22, %s829_s21 }
  0xa6   : > { %416 = vrot.lane.b32.xlu0 %v348_v17, %s829_s21 }
  0xab   : > { %v340_v27 = vpop.f32.mrf.mxu2  ;;  %v355_v32 = vpop.f32.mrf.mxu3 }
  0xac   : > { %v313_v26 = vpop.f32.mrf.mxu0  ;;  %v908_v28 = vpop.f32.mrf.mxu1 }
  0xad   : > { %420 = vrot.lane.b32.xlu2 %v899_v24, %s829_s21  ;;  %384 = vrot.lane.b32.xlu1 %v308_v20, %s829_s21 }
  0xae   : > { %382 = vrot.lane.b32.xlu0 %v305_v16, %s829_s21 }
  0xb3   : > { %v914_v30 = vpop.f32.mrf.mxu2 }
  0xb4   : > { %v315_v29 = vpop.f32.mrf.mxu0  ;;  %v330_v31 = vpop.f32.mrf.mxu1 }
  0xb5   : > { %386 = vrot.lane.b32.xlu1 %v310_v23, %s829_s21  ;;  %388 = vrot.lane.b32.xlu2 %v313_v26, %s829_s21 }
  0xb6   : > { %398 = vrot.lane.b32.xlu0 %v325_v25, %s829_s21 }
  0xbb   : > { %v345_v33 = vpop.f32.mrf.mxu2 }
  0xbd   : > { %400 = vrot.lane.b32.xlu1 %v908_v28, %s829_s21  ;;  %390 = vrot.lane.b32.xlu2 %v315_v29, %s829_s21 }
  0xbe   : > { %410 = vrot.lane.b32.xlu0 %v340_v27, %s829_s21 }
  0xc5   : > { %412 = vrot.lane.b32.xlu1 %v914_v30, %s829_s21  ;;  %402 = vrot.lane.b32.xlu2 %v330_v31, %s829_s21 }
  0xc6   : > { %422 = vrot.lane.b32.xlu0 %v355_v32, %s829_s21 }
  0xcd   : > { %414 = vrot.lane.b32.xlu2 %v345_v33, %s829_s21 }
  0xf7   : > { %v397_v38 = vpop.permute.xlu2 %396 }
  0xf8   : > { %v942_v54 = vmax.f32 %v323_v19, %v397_v38 }
  0xff   : > { %v381_v34 = vpop.permute.xlu0 %380  ;;  %v409_v43 = vpop.permute.xlu2 %408 }
 0x100   : > { %v921_v35 = vmax.f32 %v303_v12, %v381_v34  ;;  %v955_v58 = vmax.f32 %v338_v22, %v409_v43 }
 0x102   : > { %490 = vrot.lane.b32.xlu1 %v921_v35, %s830_s22 }
 0x107   : > { %v395_v36 = vpop.permute.xlu1 %394  ;;  %v393_v37 = vpop.permute.xlu0 %392 }
 0x108   : > { %v925_v39 = vmax.f32 %v318_v13, %v393_v37  ;;  %v421_v47 = vpop.permute.xlu2 %420  ;;  %v947_v56 = vmax.f32 %v882_v15, %v395_v36 }
 0x109   : > { %v1003_v12 = vmax.f32 %v899_v24, %v421_v47 }
 0x10a   : > { %502 = vrot.lane.b32.xlu1 %v925_v39, %s830_s22 }
 0x10f   : > { %v407_v40 = vpop.permute.xlu1 %406 }
 0x110   : > { %v405_v41 = vpop.permute.xlu0 %404  ;;  %v389_v52 = vpop.permute.xlu2 %388  ;;  %v960_v60 = vmax.f32 %v887_v18, %v407_v40 }
 0x111   : > { %v929_v42 = vmax.f32 %v333_v14, %v405_v41  ;;  %v972_v1 = vmax.f32 %v313_v26, %v389_v52  ;;  %v1015_v14 = vld [vmem:[%s1116_s2] ss:$0 sm:$0xff] }
 0x113   : > { %514 = vrot.lane.b32.xlu1 %v929_v42, %s830_s22 }
 0x117   : > { %v419_v44 = vpop.permute.xlu1 %418 }
 0x118   : > { %v417_v45 = vpop.permute.xlu0 %416  ;;  %v391_v61 = vpop.permute.xlu2 %390  ;;  %v1006_v13 = vmax.f32 %v893_v21, %v419_v44 }
 0x119   : > { %v933_v46 = vmax.f32 %v348_v17, %v417_v45  ;;  %v968_v63 = vmax.f32 %v315_v29, %v391_v61 }
 0x11b   : > { %526 = vrot.lane.b32.xlu1 %v933_v46, %s830_s22 }
 0x11f   : > { %v385_v48 = vpop.permute.xlu1 %384 }
 0x120   : > { %v383_v49 = vpop.permute.xlu0 %382  ;;  %v937_v50 = vmax.f32 %v308_v20, %v385_v48  ;;  %v403_v2 = vpop.permute.xlu2 %402 }
 0x121   : > { %v447_v51 = vmax.f32 %v305_v16, %v383_v49  ;;  %v980_v5 = vmax.f32 %v330_v31, %v403_v2 }
 0x122   : > { %494 = vrot.lane.b32.xlu0 %v937_v50, %s830_s22 }
 0x123   : > { %492 = vrot.lane.b32.xlu2 %v447_v51, %s830_s22 }
 0x127   : > { %v387_v53 = vpop.permute.xlu1 %386 }
 0x128   : > { %v944_v55 = vmax.f32 %v310_v23, %v387_v53  ;;  %v399_v57 = vpop.permute.xlu0 %398  ;;  %v415_v8 = vpop.permute.xlu2 %414 }
 0x129   : > { %v957_v59 = vmax.f32 %v325_v25, %v399_v57  ;;  %v993_v10 = vmax.f32 %v345_v33, %v415_v8 }
 0x12a   : > { %506 = vrot.lane.b32.xlu0 %v942_v54, %s830_s22  ;;  %496 = vrot.lane.b32.xlu1 %v944_v55, %s830_s22 }
 0x12b   : > { %504 = vrot.lane.b32.xlu2 %v947_v56, %s830_s22 }
 0x12f   : > { %v401_v3 = vpop.permute.xlu1 %400 }
 0x130   : > { %v411_v62 = vpop.permute.xlu0 %410  ;;  %v985_v7 = vmax.f32 %v908_v28, %v401_v3 }
 0x131   : > { %v970_v0 = vmax.f32 %v340_v27, %v411_v62 }
 0x132   : > { %518 = vrot.lane.b32.xlu0 %v955_v58, %s830_s22  ;;  %508 = vrot.lane.b32.xlu1 %v957_v59, %s830_s22 }
 0x133   : > { %516 = vrot.lane.b32.xlu2 %v960_v60, %s830_s22 }
 0x137   : > { %v413_v9 = vpop.permute.xlu1 %412 }
 0x138   : > { %v423_v4 = vpop.permute.xlu0 %422  ;;  %v996_v11 = vmax.f32 %v914_v30, %v413_v9 }
 0x139   : > { %v982_v6 = vmax.f32 %v355_v32, %v423_v4 }
 0x13a   : > { %520 = vrot.lane.b32.xlu1 %v970_v0, %s830_s22  ;;  %500 = vrot.lane.b32.xlu0 %v968_v63, %s830_s22 }
 0x13b   : > { %498 = vrot.lane.b32.xlu2 %v972_v1, %s830_s22 }
 0x142   : > { %532 = vrot.lane.b32.xlu1 %v982_v6, %s830_s22  ;;  %512 = vrot.lane.b32.xlu0 %v980_v5, %s830_s22 }
 0x143   : > { %510 = vrot.lane.b32.xlu2 %v985_v7, %s830_s22 }
 0x14a   : > { %524 = vrot.lane.b32.xlu0 %v993_v10, %s830_s22 }
 0x14b   : > { %522 = vrot.lane.b32.xlu2 %v996_v11, %s830_s22 }
 0x152   : > { %530 = vrot.lane.b32.xlu0 %v1003_v12, %s830_s22 }
 0x153   : > { %528 = vrot.lane.b32.xlu2 %v1006_v13, %s830_s22 }
 0x174   : > { %v491_v15 = vpop.permute.xlu1 %490 }
 0x175   : > { %v556_v16 = vmax.f32 %v921_v35, %v491_v15 }
 0x177   : > { %v582_v17 = vadd.f32 %v1015_v14, %v556_v16 }
 0x179   : > { %v604_v18 = vmax.f32 %v582_v17, 0.0 }
 0x17b   : > { %v626_v19 = vpack.c.bf16 %v604_v18, %v604_v18 }
 0x17c   : > { %v503_v20 = vpop.permute.xlu1 %502 }
 0x17d   : > { %649 = vst.msk [vmem:[%s1024_s27] sm:$0xf] %vm648_vm1, %v626_v19  ;;  %v493_v21 = vpop.permute.xlu2 %492  ;;  %v562_v22 = vmax.f32 %v925_v39, %v503_v20 }
 0x17e   : > { %v557_v23 = vmax.f32 %v447_v51, %v493_v21 }
 0x17f   : > { %v588_v24 = vadd.f32 %v1015_v14, %v562_v22 }
 0x180   : > { %v583_v25 = vadd.f32 %v1015_v14, %v557_v23 }
 0x181   : > { %v610_v26 = vmax.f32 %v588_v24, 0.0 }
 0x182   : > { %v605_v27 = vmax.f32 %v583_v25, 0.0 }
 0x183   : > { %v632_v28 = vpack.c.bf16 %v610_v26, %v610_v26 }
 0x184   : > { %v627_v29 = vpack.c.bf16 %v605_v27, %v605_v27 }
 0x185   : > { %v515_v30 = vpop.permute.xlu1 %514  ;;  %v505_v31 = vpop.permute.xlu2 %504  ;;  %655 = vst.msk [vmem:[%s1024_s27 + $0x18] sm:$0xf] %vm648_vm1, %v632_v28 }
 0x186   : > { %v568_v32 = vmax.f32 %v929_v42, %v515_v30  ;;  %v563_v33 = vmax.f32 %v947_v56, %v505_v31  ;;  %650 = vst.msk [vmem:[%s1024_s27 + $0x4] sm:$0xf] %vm648_vm1, %v627_v29 }
 0x188   : > { %v594_v34 = vadd.f32 %v1015_v14, %v568_v32  ;;  %v589_v35 = vadd.f32 %v1015_v14, %v563_v33 }
 0x18a   : > { %v616_v36 = vmax.f32 %v594_v34, 0.0  ;;  %v611_v37 = vmax.f32 %v589_v35, 0.0 }
 0x18c   : > { %v638_v38 = vpack.c.bf16 %v616_v36, %v616_v36  ;;  %v633_v39 = vpack.c.bf16 %v611_v37, %v611_v37 }
 0x18d   : > { %v527_v40 = vpop.permute.xlu1 %526  ;;  %v517_v41 = vpop.permute.xlu2 %516 }
 0x18e   : > { %661 = vst.msk [vmem:[%s1024_s27 + $0x30] sm:$0xf] %vm648_vm1, %v638_v38  ;;  %v574_v42 = vmax.f32 %v933_v46, %v527_v40  ;;  %v569_v43 = vmax.f32 %v960_v60, %v517_v41 }
 0x18f   : > { %656 = vst.msk [vmem:[%s1024_s27 + $0x1c] sm:$0xf] %vm648_vm1, %v633_v39 }
 0x190   : > { %v600_v44 = vadd.f32 %v1015_v14, %v574_v42  ;;  %v595_v45 = vadd.f32 %v1015_v14, %v569_v43 }
 0x192   : > { %v622_v47 = vmax.f32 %v600_v44, 0.0  ;;  %v617_v48 = vmax.f32 %v595_v45, 0.0 }
 0x194   : > { %v644_v49 = vpack.c.bf16 %v622_v47, %v622_v47  ;;  %v639_v51 = vpack.c.bf16 %v617_v48, %v617_v48  ;;  %v495_v52 = vpop.permute.xlu0 %494 }
 0x195   : > { %v558_v53 = vmax.f32 %v937_v50, %v495_v52  ;;  %v499_v56 = vpop.permute.xlu2 %498 }
 0x196   : > { %667 = vst.msk [vmem:[%s1024_s27 + $0x48] sm:$0xf] %vm648_vm1, %v644_v49  ;;  %v560_v46 = vmax.f32 %v972_v1, %v499_v56 }
 0x197   : > { %662 = vst.msk [vmem:[%s1024_s27 + $0x34] sm:$0xf] %vm648_vm1, %v639_v51  ;;  %v584_v57 = vadd.f32 %v1015_v14, %v558_v53 }
 0x198   : > { %v586_v60 = vadd.f32 %v1015_v14, %v560_v46 }
 0x199   : > { %v606_v61 = vmax.f32 %v584_v57, 0.0 }
 0x19a   : > { %v608_v62 = vmax.f32 %v586_v60, 0.0 }
 0x19b   : > { %v628_v2 = vpack.c.bf16 %v606_v61, %v606_v61 }
 0x19c   : > { %v630_v3 = vpack.c.bf16 %v608_v62, %v608_v62  ;;  %v507_v4 = vpop.permute.xlu0 %506  ;;  %v497_v8 = vpop.permute.xlu1 %496 }
 0x19d   : > { %651 = vst.msk [vmem:[%s1024_s27 + $0x8] sm:$0xf] %vm648_vm1, %v628_v2  ;;  %v564_v50 = vmax.f32 %v942_v54, %v507_v4  ;;  %v559_v9 = vmax.f32 %v944_v55, %v497_v8  ;;  %v511_v1 = vpop.permute.xlu2 %510 }
 0x19e   : > { %653 = vst.msk [vmem:[%s1024_s27 + $0x10] sm:$0xf] %vm648_vm1, %v630_v3  ;;  %v566_v15 = vmax.f32 %v985_v7, %v511_v1 }
 0x19f   : > { %v590_v16 = vadd.f32 %v1015_v14, %v564_v50  ;;  %v585_v17 = vadd.f32 %v1015_v14, %v559_v9 }
 0x1a0   : > { %v592_v18 = vadd.f32 %v1015_v14, %v566_v15 }
 0x1a1   : > { %v612_v19 = vmax.f32 %v590_v16, 0.0  ;;  %v607_v20 = vmax.f32 %v585_v17, 0.0 }
 0x1a2   : > { %v614_v21 = vmax.f32 %v592_v18, 0.0 }
 0x1a3   : > { %v634_v54 = vpack.c.bf16 %v612_v19, %v612_v19  ;;  %v629_v22 = vpack.c.bf16 %v607_v20, %v607_v20 }
 0x1a4   : > { %v636_v23 = vpack.c.bf16 %v614_v21, %v614_v21  ;;  %v519_v55 = vpop.permute.xlu0 %518  ;;  %v509_v24 = vpop.permute.xlu1 %508 }
 0x1a5   : > { %657 = vst.msk [vmem:[%s1024_s27 + $0x20] sm:$0xf] %vm648_vm1, %v634_v54  ;;  %v570_v7 = vmax.f32 %v955_v58, %v519_v55  ;;  %v565_v25 = vmax.f32 %v957_v59, %v509_v24  ;;  %v523_v26 = vpop.permute.xlu2 %522 }
 0x1a6   : > { %652 = vst.msk [vmem:[%s1024_s27 + $0xc] sm:$0xf] %vm648_vm1, %v629_v22  ;;  %v572_v27 = vmax.f32 %v996_v11, %v523_v26 }
 0x1a7   : > { %659 = vst.msk [vmem:[%s1024_s27 + $0x28] sm:$0xf] %vm648_vm1, %v636_v23  ;;  %v596_v28 = vadd.f32 %v1015_v14, %v570_v7  ;;  %v591_v29 = vadd.f32 %v1015_v14, %v565_v25 }
 0x1a8   : > { %v598_v30 = vadd.f32 %v1015_v14, %v572_v27 }
 0x1a9   : > { %v618_v31 = vmax.f32 %v596_v28, 0.0  ;;  %v613_v58 = vmax.f32 %v591_v29, 0.0 }
 0x1aa   : > { %v620_v32 = vmax.f32 %v598_v30, 0.0 }
 0x1ab   : > { %v640_v59 = vpack.c.bf16 %v618_v31, %v618_v31  ;;  %v635_v33 = vpack.c.bf16 %v613_v58, %v613_v58 }
 0x1ac   : > { %v642_v34 = vpack.c.bf16 %v620_v32, %v620_v32  ;;  %v521_v35 = vpop.permute.xlu1 %520  ;;  %v501_v36 = vpop.permute.xlu0 %500 }
 0x1ad   : > { %663 = vst.msk [vmem:[%s1024_s27 + $0x38] sm:$0xf] %vm648_vm1, %v640_v59  ;;  %v571_v11 = vmax.f32 %v970_v0, %v521_v35  ;;  %v561_v37 = vmax.f32 %v968_v63, %v501_v36  ;;  %v529_v38 = vpop.permute.xlu2 %528 }
 0x1ae   : > { %658 = vst.msk [vmem:[%s1024_s27 + $0x24] sm:$0xf] %vm648_vm1, %v635_v33  ;;  %v575_v39 = vmax.f32 %v1006_v13, %v529_v38 }
 0x1af   : > { %665 = vst.msk [vmem:[%s1024_s27 + $0x40] sm:$0xf] %vm648_vm1, %v642_v34  ;;  %v597_v40 = vadd.f32 %v1015_v14, %v571_v11  ;;  %v587_v41 = vadd.f32 %v1015_v14, %v561_v37 }
 0x1b0   : > { %v601_v42 = vadd.f32 %v1015_v14, %v575_v39 }
 0x1b1   : > { %v619_v43 = vmax.f32 %v597_v40, 0.0  ;;  %v609_v0 = vmax.f32 %v587_v41, 0.0 }
 0x1b2   : > { %v623_v44 = vmax.f32 %v601_v42, 0.0 }
 0x1b3   : > { %v641_v63 = vpack.c.bf16 %v619_v43, %v619_v43  ;;  %v631_v45 = vpack.c.bf16 %v609_v0, %v609_v0 }
 0x1b4   : > { %v645_v47 = vpack.c.bf16 %v623_v44, %v623_v44  ;;  %v533_v48 = vpop.permute.xlu1 %532  ;;  %v513_v13 = vpop.permute.xlu0 %512 }
 0x1b5   : > { %664 = vst.msk [vmem:[%s1024_s27 + $0x3c] sm:$0xf] %vm648_vm1, %v641_v63  ;;  %v577_v49 = vmax.f32 %v982_v6, %v533_v48  ;;  %v567_v51 = vmax.f32 %v980_v5, %v513_v13 }
 0x1b6   : > { %654 = vst.msk [vmem:[%s1024_s27 + $0x14] sm:$0xf] %vm648_vm1, %v631_v45 }
 0x1b7   : > { %668 = vst.msk [vmem:[%s1024_s27 + $0x4c] sm:$0xf] %vm648_vm1, %v645_v47  ;;  %v603_v52 = vadd.f32 %v1015_v14, %v577_v49  ;;  %v593_v53 = vadd.f32 %v1015_v14, %v567_v51 }
 0x1b9   : > { %v625_v56 = vmax.f32 %v603_v52, 0.0  ;;  %v615_v46 = vmax.f32 %v593_v53, 0.0 }
 0x1bb   : > { %v647_v57 = vpack.c.bf16 %v625_v56, %v625_v56  ;;  %v637_v60 = vpack.c.bf16 %v615_v46, %v615_v46 }
 0x1bc   : > { %v525_v61 = vpop.permute.xlu0 %524 }
 0x1bd   : > { %670 = vst.msk [vmem:[%s1024_s27 + $0x54] sm:$0xf] %vm648_vm1, %v647_v57  ;;  %v573_v6 = vmax.f32 %v993_v10, %v525_v61 }
 0x1be   : > { %660 = vst.msk [vmem:[%s1024_s27 + $0x2c] sm:$0xf] %vm648_vm1, %v637_v60 }
 0x1bf   : > { %v599_v5 = vadd.f32 %v1015_v14, %v573_v6 }
 0x1c1   : > { %v621_v62 = vmax.f32 %v599_v5, 0.0 }
 0x1c3   : > { %v643_v2 = vpack.c.bf16 %v621_v62, %v621_v62 }
 0x1c4   : > { %v531_v3 = vpop.permute.xlu0 %530 }
 0x1c5   : > { %666 = vst.msk [vmem:[%s1024_s27 + $0x44] sm:$0xf] %vm648_vm1, %v643_v2  ;;  %v576_v4 = vmax.f32 %v1003_v12, %v531_v3 }
 0x1c7   : > { %v602_v8 = vadd.f32 %v1015_v14, %v576_v4 }
 0x1c9   : > { %v624_v50 = vmax.f32 %v602_v8, 0.0 }
 0x1cb   : > { %v646_v9 = vpack.c.bf16 %v624_v50, %v624_v50 }
 0x1cd   : > { %669 = vst.msk [vmem:[%s1024_s27 + $0x50] sm:$0xf] %vm648_vm1, %v646_v9 }
 0x1ce PF: > { %s13_s12 = sadd.s32 1, %s827_s12  }
 0x1cf   : > { %p10_p4 = scmp.ge.s32.totalorder %s13_s12, 4  }
 0x1d1   :  { %12 = sbr.rel (!%p10_p4) target bundleno = 1 (0x1), region = 62 }

// kernel: cnn_forward.4
= control target key start
LH: loop header
LB: loop body
LE: loop exit
PB: predicated region body
PF: predicated region fallthrough
CT: control target
= control target key end

     0   :  { %s654_s12 = smov 0   ;;  %s730_s0 = inlined_call_operand.vmem [shape: bf16[64,256], index: 0, kind: input, shape index: {}]   ;;  %s731_s1 = inlined_call_operand.vmem [shape: bf16[256,128], index: 1, kind: input, shape index: {}]   ;;  %s732_s2 = inlined_call_operand.vmem [shape: f32[1,32], index: 2, kind: input, shape index: {}]   ;;  %s733_s3 = inlined_call_operand.vmem [shape: bf16[64,32], index: 3, kind: output, shape index: {}]  }
   0x1 LB: > { %s484_s13 = sadd.s32 4294967295, %s630_s12   ;;  %p488_p0 = scmp.ge.s32.totalorder %s630_s12, 1  ;;  %s630_s12 = sphi %s654_s12, %s13_s12  }
   0x2   : > { %p139_p1 = scmp.lt.s32.totalorder %s630_s12, 3 }
   0x4   : > { %p140_p2 = pnand %p488_p0, %p139_p1 }
   0x5   : > { %s489_s26 = sshll.u32 (!%p140_p2), %s484_s13, 2  ;;  %s632_s25 = smov (!%p140_p2), 96  }
   0x6   : > { %143 = sbr.rel (%p140_p2) target bundleno = 427 (0x1ab), region = 32  ;;  %p165_p3 = scmp.lt.s32.totalorder (!%p140_p2), %s489_s26, 7 }
   0x7   : > { %s633_s27 = smov (!%p140_p2), 64  }
   0xb   : > { %v588_v0 = vld [vmem:[%s731_s1 + $0x38] sm:$0xff]  ;;  %v587_v2 = vld [vmem:[%s731_s1 + $0x30] sm:$0xff]  ;;  %v586_v4 = vld [vmem:[%s731_s1 + $0x28] sm:$0xff]  ;;  %s735_s26 = smov (!%p165_p3, %s489_s26), 7  ;;  %vm423_vm0 = vcmask 257024  }
   0xc   : > { %v596_v1 = vld [vmem:[%s731_s1 + $0x78] sm:$0xff]  ;;  %329 = vmatpush.bf16.msra.mxu0 %v588_v0  ;;  %597 = vmatpush.bf16.msra.mxu2 %v588_v0  ;;  %v595_v3 = vld [vmem:[%s731_s1 + $0x70] sm:$0xff]  ;;  %v594_v5 = vld [vmem:[%s731_s1 + $0x68] sm:$0xff]  ;;  %s576_s13 = sshll.u32 %s735_s26, 3  ;;  %s493_s30 = sshll.u32 %s735_s26, 2 }
   0xd   : > { %348 = vmatpush.bf16.msra.mxu1 %v596_v1  ;;  %605 = vmatpush.bf16.msra.mxu3 %v596_v1  ;;  %v585_v6 = vld [vmem:[%s731_s1 + $0x20] sm:$0xff]  ;;  %v584_v8 = vld [vmem:[%s731_s1 + $0x18] sm:$0xff]  ;;  %v583_v10 = vld [vmem:[%s731_s1 + $0x10] sm:$0xff]  ;;  %s169_s18 = scalar_lea.vmem %s730_s0, %s576_s13  ;;  %s175_s6 = scalar_lea.vmem %s733_s3, %s493_s30 }
   0xe   : > { %v593_v7 = vld [vmem:[%s731_s1 + $0x60] sm:$0xff]  ;;  %v592_v9 = vld [vmem:[%s731_s1 + $0x58] sm:$0xff]  ;;  %v591_v11 = vld [vmem:[%s731_s1 + $0x50] sm:$0xff] }
   0xf   : > { %v582_v12 = vld [vmem:[%s731_s1 + $0x8] sm:$0xff]  ;;  %v581_v14 = vld [vmem:[%s731_s1] sm:$0xff]  ;;  %v504_v18 = vld [vmem:[%s169_s18 + $0x10] sm:$0xf] }
  0x10   : > { %330 = vmatpush.bf16.msra.mxu0 %v587_v2  ;;  %598 = vmatpush.bf16.msra.mxu2 %v587_v2  ;;  %v590_v13 = vld [vmem:[%s731_s1 + $0x48] sm:$0xff]  ;;  %v589_v15 = vld [vmem:[%s731_s1 + $0x40] sm:$0xff]  ;;  %v580_v19 = vld [vmem:[%s169_s18 + $0x14] sm:$0xf0] }
  0x11   : > { %349 = vmatpush.bf16.msra.mxu1 %v595_v3  ;;  %606 = vmatpush.bf16.msra.mxu3 %v595_v3  ;;  %v496_v16 = vld [vmem:[%s169_s18] sm:$0xf]  ;;  %v578_v17 = vld [vmem:[%s169_s18 + $0x4] sm:$0xf0]  ;;  %v577_v20 = vld [vmem:[%s169_s18 + $0x4] sm:$0xf]  ;;  %v505_v25 = vor.u32 %v580_v19, %v504_v18 }
  0x12   : > { %v498_v21 = vld [vmem:[%s169_s18 + $0x8] sm:$0xf0]  ;;  %v579_v22 = vld [vmem:[%s169_s18 + $0x14] sm:$0xf]  ;;  %v506_v23 = vld [vmem:[%s169_s18 + $0x18] sm:$0xf0]  ;;  %v497_v24 = vor.u32 %v578_v17, %v496_v16 }
  0x13   : > { %v501_v26 = vor.u32 %v577_v20, %v498_v21  ;;  %v509_v27 = vor.u32 %v579_v22, %v506_v23  ;;  %v623_v48 = vld [vmem:[%s732_s2] ss:$0 sm:$0xff] }
  0x14   : > { %331 = vmatpush.bf16.msra.mxu0 %v586_v4  ;;  %599 = vmatpush.bf16.msra.mxu2 %v586_v4 }
  0x15   : > { %350 = vmatpush.bf16.msra.mxu1 %v594_v5  ;;  %607 = vmatpush.bf16.msra.mxu3 %v594_v5 }
  0x18   : > { %332 = vmatpush.bf16.msra.mxu0 %v585_v6  ;;  %600 = vmatpush.bf16.msra.mxu2 %v585_v6 }
  0x19   : > { %351 = vmatpush.bf16.msra.mxu1 %v593_v7  ;;  %608 = vmatpush.bf16.msra.mxu3 %v593_v7 }
  0x1c   : > { %333 = vmatpush.bf16.msra.mxu0 %v584_v8  ;;  %601 = vmatpush.bf16.msra.mxu2 %v584_v8 }
  0x1d   : > { %352 = vmatpush.bf16.msra.mxu1 %v592_v9  ;;  %609 = vmatpush.bf16.msra.mxu3 %v592_v9 }
  0x20   : > { %334 = vmatpush.bf16.msra.mxu0 %v583_v10  ;;  %602 = vmatpush.bf16.msra.mxu2 %v583_v10 }
  0x21   : > { %353 = vmatpush.bf16.msra.mxu1 %v591_v11  ;;  %610 = vmatpush.bf16.msra.mxu3 %v591_v11 }
  0x24   : > { %335 = vmatpush.bf16.msra.mxu0 %v582_v12  ;;  %603 = vmatpush.bf16.msra.mxu2 %v582_v12 }
  0x25   : > { %354 = vmatpush.bf16.msra.mxu1 %v590_v13  ;;  %611 = vmatpush.bf16.msra.mxu3 %v590_v13 }
  0x28   : > { %336 = vmatpush.bf16.msra.mxu0 %v581_v14  ;;  %604 = vmatpush.bf16.msra.mxu2 %v581_v14 }
  0x29   : > { %355 = vmatpush.bf16.msra.mxu1 %v589_v15  ;;  %612 = vmatpush.bf16.msra.mxu3 %v589_v15 }
  0x2b   : > { %337 = vmatmul.bf16.vlgmr.msra.gmra.mxu0 %v497_v24  ;;  %342 = vmatmul.bf16.vlgmr.msra.gmra.mxu2 %v505_v25 }
  0x2c   : > { %356 = vmatmul.bf16.vlgmr.msra.gmra.mxu1 %v501_v26  ;;  %361 = vmatmul.bf16.vlgmr.msra.gmra.mxu3 %v509_v27 }
  0xa8   : > { %v338_v28 = vpop.f32.mrf.mxu0 }
  0xa9   : > { %v357_v29 = vpop.f32.mrf.mxu1 }
  0xaa   : > { %v358_v30 = vadd.f32 %v357_v29, %v338_v28 }
  0xac   : > { %371 = vrot.lane.b32.xlu0 %v358_v30, %s632_s25 }
  0xae   : > { %v343_v31 = vpop.f32.mrf.mxu2 }
  0xaf   : > { %v362_v32 = vpop.f32.mrf.mxu3 }
  0xb0   : > { %v363_v33 = vadd.f32 %v362_v32, %v343_v31  ;;  %v340_v34 = vpop.f32.mrf.mxu0 }
  0xb1   : > { %v359_v35 = vpop.f32.mrf.mxu1 }
  0xb2   : > { %v360_v36 = vadd.f32 %v359_v35, %v340_v34  ;;  %375 = vrot.lane.b32.xlu1 %v363_v33, %s632_s25 }
  0xb4   : > { %373 = vrot.lane.b32.xlu0 %v360_v36, %s632_s25 }
  0xb6   : > { %v345_v37 = vpop.f32.mrf.mxu2 }
  0xb7   : > { %v364_v38 = vpop.f32.mrf.mxu3 }
  0xb8   : > { %v365_v39 = vadd.f32 %v364_v38, %v345_v37 }
  0xba   : > { %377 = vrot.lane.b32.xlu1 %v365_v39, %s632_s25 }
 0x11e   : > { %v372_v40 = vpop.permute.xlu0 %371 }
 0x11f   : > { %v383_v41 = vmax.f32 %v358_v30, %v372_v40 }
 0x121   : > { %391 = vrot.lane.b32.xlu2 %v383_v41, %s633_s27 }
 0x124   : > { %v376_v42 = vpop.permute.xlu1 %375 }
 0x125   : > { %v385_v43 = vmax.f32 %v363_v33, %v376_v42 }
 0x126   : > { %v374_v44 = vpop.permute.xlu0 %373 }
 0x127   : > { %v384_v45 = vmax.f32 %v360_v36, %v374_v44  ;;  %395 = vrot.lane.b32.xlu0 %v385_v43, %s633_s27 }
 0x129   : > { %393 = vrot.lane.b32.xlu2 %v384_v45, %s633_s27 }
 0x12c   : > { %v378_v46 = vpop.permute.xlu1 %377 }
 0x12d   : > { %v386_v47 = vmax.f32 %v365_v39, %v378_v46 }
 0x12f   : > { %397 = vrot.lane.b32.xlu1 %v386_v47, %s633_s27 }
 0x17b   : > { %v392_v49 = vpop.permute.xlu2 %391 }
 0x17c   : > { %v403_v50 = vmax.f32 %v383_v41, %v392_v49 }
 0x17e   : > { %v411_v51 = vadd.f32 %v623_v48, %v403_v50 }
 0x180   : > { %v415_v52 = vmax.f32 %v411_v51, 0.0 }
 0x182   : > { %v419_v53 = vpack.c.bf16 %v415_v52, %v415_v52 }
 0x183   : > { %v394_v54 = vpop.permute.xlu2 %393 }
 0x184   : > { %424 = vst.msk [vmem:[%s175_s6] sm:$0xf] %vm423_vm0, %v419_v53  ;;  %v404_v55 = vmax.f32 %v384_v45, %v394_v54 }
 0x186   : > { %v412_v56 = vadd.f32 %v623_v48, %v404_v55 }
 0x188   : > { %v416_v57 = vmax.f32 %v412_v56, 0.0 }
 0x18a   : > { %v420_v58 = vpack.c.bf16 %v416_v57, %v416_v57 }
 0x18c   : > { %425 = vst.msk [vmem:[%s175_s6 + $0x4] sm:$0xf] %vm423_vm0, %v420_v58 }
 0x199   : > { %v396_v59 = vpop.permute.xlu0 %395 }
 0x19a   : > { %v405_v60 = vmax.f32 %v385_v43, %v396_v59 }
 0x19c   : > { %v413_v61 = vadd.f32 %v623_v48, %v405_v60 }
 0x19e   : > { %v417_v62 = vmax.f32 %v413_v61, 0.0 }
 0x1a0   : > { %v421_v63 = vpack.c.bf16 %v417_v62, %v417_v62 }
 0x1a1   : > { %v398_v0 = vpop.permute.xlu1 %397 }
 0x1a2   : > { %426 = vst.msk [vmem:[%s175_s6 + $0x8] sm:$0xf] %vm423_vm0, %v421_v63  ;;  %v406_v1 = vmax.f32 %v386_v47, %v398_v0 }
 0x1a4   : > { %v414_v2 = vadd.f32 %v623_v48, %v406_v1 }
 0x1a6   : > { %v418_v3 = vmax.f32 %v414_v2, 0.0 }
 0x1a8   : > { %v422_v4 = vpack.c.bf16 %v418_v3, %v418_v3 }
 0x1aa   : > { %427 = vst.msk [vmem:[%s175_s6 + $0xc] sm:$0xf] %vm423_vm0, %v422_v4 }
 0x1ab PF: > { %s13_s12 = sadd.s32 1, %s630_s12  }
 0x1ac   : > { %p10_p4 = scmp.ge.s32.totalorder %s13_s12, 4  }
 0x1ae   :  { %12 = sbr.rel (!%p10_p4) target bundleno = 1 (0x1), region = 62 }

// kernel: cnn_forward.5
= control target key start
LH: loop header
LB: loop body
LE: loop exit
PB: predicated region body
PF: predicated region fallthrough
CT: control target
= control target key end

     0   :  { %vm462_vm0 = vcmask 261120   ;;  %s1078_s1 = inlined_call_operand.vmem [shape: bf16[800,128], index: 1, kind: input, shape index: {}]   ;;  %s1079_s2 = inlined_call_operand.vmem [shape: f32[1,128], index: 2, kind: input, shape index: {}]   ;;  %s1080_s0 = inlined_call_operand.vmem [shape: bf16[16,800], index: 0, kind: input, shape index: {}]   ;;  %s1081_s3 = inlined_call_operand.vmem [shape: f32[16,128], index: 3, kind: output, shape index: {}]  }
   0x1   :  { %v813_v0 = vld [vmem:[%s1078_s1 + $0x38] sm:$0xff]  ;;  %v812_v4 = vld [vmem:[%s1078_s1 + $0x30] sm:$0xff]  ;;  %v811_v8 = vld [vmem:[%s1078_s1 + $0x28] sm:$0xff] }
   0x2   :  { %v821_v1 = vld [vmem:[%s1078_s1 + $0x78] sm:$0xff]  ;;  %466 = vmatpush.bf16.msra.mxu0 %v813_v0  ;;  %v820_v5 = vld [vmem:[%s1078_s1 + $0x70] sm:$0xff]  ;;  %v819_v9 = vld [vmem:[%s1078_s1 + $0x68] sm:$0xff] }
   0x3   :  { %v829_v2 = vld [vmem:[%s1078_s1 + $0xb8] sm:$0xff]  ;;  %480 = vmatpush.bf16.msra.mxu1 %v821_v1  ;;  %v828_v6 = vld [vmem:[%s1078_s1 + $0xb0] sm:$0xff]  ;;  %v827_v10 = vld [vmem:[%s1078_s1 + $0xa8] sm:$0xff] }
   0x4   :  { %v837_v3 = vld [vmem:[%s1078_s1 + $0xf8] sm:$0xff]  ;;  %494 = vmatpush.bf16.msra.mxu2 %v829_v2  ;;  %v836_v7 = vld [vmem:[%s1078_s1 + $0xf0] sm:$0xff]  ;;  %v835_v11 = vld [vmem:[%s1078_s1 + $0xe8] sm:$0xff] }
   0x5   :  { %508 = vmatpush.bf16.msra.mxu3 %v837_v3  ;;  %v810_v12 = vld [vmem:[%s1078_s1 + $0x20] sm:$0xff]  ;;  %v809_v16 = vld [vmem:[%s1078_s1 + $0x18] sm:$0xff]  ;;  %v808_v20 = vld [vmem:[%s1078_s1 + $0x10] sm:$0xff] }
   0x6   :  { %467 = vmatpush.bf16.msra.mxu0 %v812_v4  ;;  %v818_v13 = vld [vmem:[%s1078_s1 + $0x60] sm:$0xff]  ;;  %v817_v17 = vld [vmem:[%s1078_s1 + $0x58] sm:$0xff]  ;;  %v816_v21 = vld [vmem:[%s1078_s1 + $0x50] sm:$0xff] }
   0x7   :  { %481 = vmatpush.bf16.msra.mxu1 %v820_v5  ;;  %v826_v14 = vld [vmem:[%s1078_s1 + $0xa0] sm:$0xff]  ;;  %v825_v18 = vld [vmem:[%s1078_s1 + $0x98] sm:$0xff]  ;;  %v824_v22 = vld [vmem:[%s1078_s1 + $0x90] sm:$0xff] }
   0x8   :  { %495 = vmatpush.bf16.msra.mxu2 %v828_v6  ;;  %v834_v15 = vld [vmem:[%s1078_s1 + $0xe0] sm:$0xff]  ;;  %v833_v19 = vld [vmem:[%s1078_s1 + $0xd8] sm:$0xff]  ;;  %v832_v23 = vld [vmem:[%s1078_s1 + $0xd0] sm:$0xff] }
   0x9   :  { %509 = vmatpush.bf16.msra.mxu3 %v836_v7  ;;  %v807_v24 = vld [vmem:[%s1078_s1 + $0x8] sm:$0xff]  ;;  %v806_v28 = vld [vmem:[%s1078_s1] sm:$0xff]  ;;  %v802_v31 = vld [vmem:[%s1080_s0 + $0x18] sm:$0xf0] }
   0xa   :  { %468 = vmatpush.bf16.msra.mxu0 %v811_v8  ;;  %v815_v25 = vld [vmem:[%s1078_s1 + $0x48] sm:$0xff]  ;;  %v814_v29 = vld [vmem:[%s1078_s1 + $0x40] sm:$0xff]  ;;  %v845_v34 = vld [vmem:[%s1078_s1 + $0x138] sm:$0xff] }
   0xb   :  { %482 = vmatpush.bf16.msra.mxu1 %v819_v9  ;;  %v823_v26 = vld [vmem:[%s1078_s1 + $0x88] sm:$0xff]  ;;  %v572_v30 = vld [vmem:[%s1080_s0] sm:$0xf]  ;;  %v799_v32 = vld [vmem:[%s1080_s0 + $0x4] sm:$0xf] }
   0xc   :  { %496 = vmatpush.bf16.msra.mxu2 %v827_v10  ;;  %v831_v27 = vld [vmem:[%s1078_s1 + $0xc8] sm:$0xff]  ;;  %v574_v33 = vld [vmem:[%s1080_s0 + $0x1c] sm:$0xf0]  ;;  %v853_v35 = vld [vmem:[%s1078_s1 + $0x178] sm:$0xff]  ;;  %v573_v40 = vor.u32 %v802_v31, %v572_v30 }
   0xd   :  { %510 = vmatpush.bf16.msra.mxu3 %v835_v11  ;;  %v822_v36 = vld [vmem:[%s1078_s1 + $0x80] sm:$0xff]  ;;  %v580_v38 = vld [vmem:[%s1080_s0 + $0x8] sm:$0xf]  ;;  %v800_v41 = vld [vmem:[%s1080_s0 + $0xc] sm:$0xf]  ;;  %v577_v43 = vor.u32 %v799_v32, %v574_v33 }
   0xe   :  { %469 = vmatpush.bf16.msra.mxu0 %v810_v12  ;;  %v830_v37 = vld [vmem:[%s1078_s1 + $0xc0] sm:$0xff]  ;;  %v582_v42 = vld [vmem:[%s1080_s0 + $0x24] sm:$0xf0]  ;;  %v844_v45 = vld [vmem:[%s1078_s1 + $0x130] sm:$0xff] }
   0xf   :  { %483 = vmatpush.bf16.msra.mxu1 %v818_v13  ;;  %v803_v39 = vld [vmem:[%s1080_s0 + $0x20] sm:$0xf0]  ;;  %v855_v44 = vld [vmem:[%s1078_s1 + $0x188] sm:$0xff]  ;;  %v852_v46 = vld [vmem:[%s1078_s1 + $0x170] sm:$0xff]  ;;  %v585_v48 = vor.u32 %v800_v41, %v582_v42 }
  0x10   :  { %497 = vmatpush.bf16.msra.mxu2 %v826_v14  ;;  %v581_v47 = vor.u32 %v803_v39, %v580_v38  ;;  %v854_v49 = vld [vmem:[%s1078_s1 + $0x180] sm:$0xff]  ;;  %v843_v50 = vld [vmem:[%s1078_s1 + $0x128] sm:$0xff]  ;;  %v841_v54 = vld [vmem:[%s1078_s1 + $0x118] sm:$0xff] }
  0x11   :  { %511 = vmatpush.bf16.msra.mxu3 %v834_v15  ;;  %v851_v51 = vld [vmem:[%s1078_s1 + $0x168] sm:$0xff]  ;;  %v842_v52 = vld [vmem:[%s1078_s1 + $0x120] sm:$0xff]  ;;  %v849_v55 = vld [vmem:[%s1078_s1 + $0x158] sm:$0xff] }
  0x12   :  { %470 = vmatpush.bf16.msra.mxu0 %v809_v16  ;;  %v850_v53 = vld [vmem:[%s1078_s1 + $0x160] sm:$0xff]  ;;  %v596_v56 = vld [vmem:[%s1080_s0 + $0x18] sm:$0xf]  ;;  %v805_v57 = vld [vmem:[%s1080_s0 + $0x30] sm:$0xf0] }
  0x13   :  { %484 = vmatpush.bf16.msra.mxu1 %v817_v17  ;;  %v840_v58 = vld [vmem:[%s1078_s1 + $0x110] sm:$0xff]  ;;  %v597_v60 = vor.u32 %v805_v57, %v596_v56  ;;  %v839_v61 = vld [vmem:[%s1078_s1 + $0x108] sm:$0xff]  ;;  %v838_v63 = vld [vmem:[%s1078_s1 + $0x100] sm:$0xff] }
  0x14   :  { %498 = vmatpush.bf16.msra.mxu2 %v825_v18  ;;  %v848_v59 = vld [vmem:[%s1078_s1 + $0x150] sm:$0xff]  ;;  %v847_v62 = vld [vmem:[%s1078_s1 + $0x148] sm:$0xff]  ;;  %v846_v0 = vld [vmem:[%s1078_s1 + $0x140] sm:$0xff] }
  0x15   :  { %512 = vmatpush.bf16.msra.mxu3 %v833_v19  ;;  %v588_v1 = vld [vmem:[%s1080_s0 + $0x10] sm:$0xf]  ;;  %v804_v2 = vld [vmem:[%s1080_s0 + $0x28] sm:$0xf0]  ;;  %v801_v3 = vld [vmem:[%s1080_s0 + $0x14] sm:$0xf] }
  0x16   :  { %471 = vmatpush.bf16.msra.mxu0 %v808_v20  ;;  %v590_v4 = vld [vmem:[%s1080_s0 + $0x2c] sm:$0xf0]  ;;  %v589_v5 = vor.u32 %v804_v2, %v588_v1  ;;  %v856_v10 = vld [vmem:[%s1079_s2] ss:$0 sm:$0xff] }
  0x17   :  { %485 = vmatpush.bf16.msra.mxu1 %v816_v21  ;;  %v593_v6 = vor.u32 %v801_v3, %v590_v4 }
  0x18   :  { %499 = vmatpush.bf16.msra.mxu2 %v824_v22 }
  0x19   :  { %513 = vmatpush.bf16.msra.mxu3 %v832_v23 }
  0x1a   :  { %472 = vmatpush.bf16.msra.mxu0 %v807_v24 }
  0x1b   :  { %486 = vmatpush.bf16.msra.mxu1 %v815_v25 }
  0x1c   :  { %500 = vmatpush.bf16.msra.mxu2 %v823_v26 }
  0x1d   :  { %514 = vmatpush.bf16.msra.mxu3 %v831_v27 }
  0x1e   :  { %473 = vmatpush.bf16.msra.mxu0 %v806_v28 }
  0x1f   :  { %487 = vmatpush.bf16.msra.mxu1 %v814_v29 }
  0x20   :  { %501 = vmatpush.bf16.msra.mxu2 %v822_v36 }
  0x21   :  { %515 = vmatpush.bf16.msra.mxu3 %v830_v37  ;;  %474 = vmatmul.bf16.vlgmr.msra.gmra.mxu0 %v573_v40 }
  0x22   :  { %522 = vmatpush.bf16.msrb.mxu0 %v845_v34  ;;  %488 = vmatmul.bf16.vlgmr.msra.gmra.mxu1 %v577_v43 }
  0x23   :  { %536 = vmatpush.bf16.msrb.mxu1 %v853_v35  ;;  %502 = vmatmul.bf16.vlgmr.msra.gmra.mxu2 %v581_v47 }
  0x24   :  { %556 = vmatpush.bf16.msrb.mxu2 %v855_v44  ;;  %516 = vmatmul.bf16.vlgmr.msra.gmra.mxu3 %v585_v48 }
  0x26   :  { %523 = vmatpush.bf16.msrb.mxu0 %v844_v45 }
  0x27   :  { %537 = vmatpush.bf16.msrb.mxu1 %v852_v46 }
  0x28   :  { %557 = vmatpush.bf16.msrb.mxu2 %v854_v49 }
  0x2a   :  { %524 = vmatpush.bf16.msrb.mxu0 %v843_v50 }
  0x2b   :  { %538 = vmatpush.bf16.msrb.mxu1 %v851_v51 }
  0x2e   :  { %525 = vmatpush.bf16.msrb.mxu0 %v842_v52 }
  0x2f   :  { %539 = vmatpush.bf16.msrb.mxu1 %v850_v53 }
  0x32   :  { %526 = vmatpush.bf16.msrb.mxu0 %v841_v54 }
  0x33   :  { %540 = vmatpush.bf16.msrb.mxu1 %v849_v55  ;;  %798 = vmatmul.msk.bf16.vlgmr.msrb.gmra.mxu2 %vm462_vm0, %v597_v60 }
  0x36   :  { %527 = vmatpush.bf16.msrb.mxu0 %v840_v58 }
  0x37   :  { %541 = vmatpush.bf16.msrb.mxu1 %v848_v59 }
  0x3a   :  { %528 = vmatpush.bf16.msrb.mxu0 %v839_v61 }
  0x3b   :  { %542 = vmatpush.bf16.msrb.mxu1 %v847_v62 }
  0x3e   :  { %529 = vmatpush.bf16.msrb.mxu0 %v838_v63 }
  0x3f   :  { %543 = vmatpush.bf16.msrb.mxu1 %v846_v0 }
  0x41   :  { %530 = vmatmul.bf16.vlgmr.msrb.gmra.mxu0 %v589_v5 }
  0x42   :  { %544 = vmatmul.bf16.vlgmr.msrb.gmra.mxu1 %v593_v6 }
  0x9e   :  { %v475_v7 = vpop.f32.mrf.mxu0 }
  0x9f   :  { %v489_v8 = vpop.f32.mrf.mxu1  ;;  %v476_v11 = vadd.f32 %v856_v10, %v475_v7 }
  0xa1   :  { %v490_v12 = vadd.f32 %v489_v8, %v476_v11 }
  0xa6   :  { %v503_v9 = vpop.f32.mrf.mxu2  ;;  %v477_v13 = vpop.f32.mrf.mxu0 }
  0xa7   :  { %v491_v14 = vpop.f32.mrf.mxu1  ;;  %v517_v16 = vpop.f32.mrf.mxu3  ;;  %v504_v17 = vadd.f32 %v503_v9, %v490_v12  ;;  %v478_v18 = vadd.f32 %v856_v10, %v477_v13 }
  0xa9   :  { %v518_v19 = vadd.f32 %v517_v16, %v504_v17  ;;  %v492_v20 = vadd.f32 %v491_v14, %v478_v18 }
  0xae   :  { %v505_v15 = vpop.f32.mrf.mxu2 }
  0xaf   :  { %v506_v25 = vadd.f32 %v505_v15, %v492_v20  ;;  %v519_v27 = vpop.f32.mrf.mxu3 }
  0xb1   :  { %v520_v29 = vadd.f32 %v519_v27, %v506_v25 }
  0xb6   :  { %v559_v24 = vpop.f32.mrf.mxu2 }
  0xbe   :  { %v531_v21 = vpop.f32.mrf.mxu0  ;;  %v561_v34 = vpop.f32.mrf.mxu2 }
  0xbf   :  { %v545_v22 = vpop.f32.mrf.mxu1  ;;  %v532_v23 = vadd.f32 %v531_v21, %v518_v19 }
  0xc1   :  { %v546_v26 = vadd.f32 %v545_v22, %v532_v23 }
  0xc3   :  { %v560_v28 = vadd.f32 %v559_v24, %v546_v26 }
  0xc5   :  { %564 = vst [vmem:[%s1081_s3] sm:$0xff] %v560_v28 }
  0xc6   :  { %v533_v30 = vpop.f32.mrf.mxu0 }
  0xc7   :  { %v534_v31 = vadd.f32 %v533_v30, %v520_v29  ;;  %v547_v32 = vpop.f32.mrf.mxu1 }
  0xc9   :  { %v548_v33 = vadd.f32 %v547_v32, %v534_v31 }
  0xcb   :  { %v562_v35 = vadd.f32 %v561_v34, %v548_v33 }
  0xcd   :  { %565 = vst [vmem:[%s1081_s3 + $0x8] sm:$0xff] %v562_v35 }

</bundles_post_ra>
